<compile_context>
chip_gen: v5e
topology: v5e:2x2
jax: 0.10.0
libtpu: 0.0.40
codegen_flags: <defaults>
</compile_context>

<pallas_src>
import functools

import jax
import jax.numpy as jnp
from jax.experimental import pallas as pl
from jax.experimental.pallas import tpu as pltpu

BN_EPS = 1e-5
LANE = 128
ACC_CAP_BYTES = 4 << 20  # budget for the [tb, C, 128] f32 accumulator


def _round_up(n, m):
    return ((n + m - 1) // m) * m


def _vmem_budget():
    """Generation-aware tiling / VMEM budget (v5e/v6e: 128 MiB, v7x: 64 MiB)."""
    try:
        cap = int(pltpu.get_tpu_info().vmem_capacity_bytes)
    except Exception:  # be conservative if the query is unavailable
        cap = 64 * 1024 * 1024
    if cap >= 96 * 1024 * 1024:          # v5e / v6e
        return dict(tile_cap=8 << 20, max_lanes=8192,
                    vmem_limit=64 * 1024 * 1024)
    return dict(tile_cap=3 << 20, max_lanes=4096,     # v7x
                vmem_limit=44 * 1024 * 1024)


def _pick_batch_tile(B, C):
    """Largest multiple-of-8 divisor of B (<=64) keeping >=2 B-blocks and the
    [tb, C, 128] f32 accumulator under ACC_CAP_BYTES."""
    if B % 8 != 0:
        return B  # full-extent block is always legal
    best = 8
    for t in range(8, min(B // 2, 64) + 1, 8):
        if B % t == 0 and t * C * LANE * 4 <= ACC_CAP_BYTES:
            best = t
    return best


def _pick_hw_tile(HW_pad, tb, C, itemsize, tile_cap, max_lanes):
    """Largest multiple-of-128 divisor of HW_pad under the byte/lane caps."""
    best = LANE
    t = LANE
    cap = min(HW_pad, max_lanes)
    while t <= cap:
        if HW_pad % t == 0 and tb * C * t * itemsize <= tile_cap:
            best = t
        t += LANE
    return best


def _pick_n_tile(N_pad, F_pad, itemsize, tile_cap=4 << 20):
    """Multiple-of-128 divisor of N_pad; >=2 blocks when possible (megacore)."""
    if N_pad == LANE:
        return LANE
    limit = max(LANE, N_pad // 2)
    best = LANE
    t = LANE
    while t <= limit:
        if N_pad % t == 0 and t * F_pad * itemsize <= tile_cap:
            best = t
        t += LANE
    return best


def _gap_linear_kernel(x_ref, wfeat_ref, bfeat_ref, h_ref, acc_ref, *,
                       inv_hw, nchunks):
    """Streamed global-average-pool + Linear(C -> F_pad).

    x_ref:     [tb, C, thw]     x tile (HW streamed along grid axis 1)
    wfeat_ref: [F_pad, C]       feature_extractor.fc weight (PyTorch [out, in])
    bfeat_ref: [1, F_pad]       feature_extractor.fc bias (zero-padded, f32)
    h_ref:     [tb, F_pad]      pre-BN activations (resident across HW axis)
    acc_ref:   [tb, C, 128]     VMEM scratch: lane-aligned running sums (f32)
    """
    hw_i = pl.program_id(1)

    @pl.when(hw_i == 0)
    def _():
        acc_ref[...] = jnp.zeros_like(acc_ref)

    # Lane-aligned VPU accumulation: add 128-lane chunks of this tile into the
    # [tb, C, 128] accumulator.  No cross-lane (XLU) work in the streaming loop.
    acc = acc_ref[...]
    for c in range(nchunks):
        chunk = x_ref[:, :, c * LANE:(c + 1) * LANE]      # static aligned slice
        acc = acc + chunk.astype(jnp.float32)
    acc_ref[...] = acc

    @pl.when(hw_i == pl.num_programs(1) - 1)
    def _():
        # Single cross-lane reduce, then global average (zero-padding of HW
        # contributes 0; inv_hw = 1/true_HW keeps the mean exact).
        feat = jnp.sum(acc_ref[...], axis=-1) * inv_hw    # [tb, C]
        # MXU in the weight dtype (no f32 upcast of bf16 weights); contract on
        # the last (lane) axis of both operands — weights stay [F_pad, C].
        h = jax.lax.dot_general(
            feat.astype(wfeat_ref.dtype), wfeat_ref[...],
            dimension_numbers=(((1,), (1,)), ((), ())),
            preferred_element_type=jnp.float32)
        h_ref[...] = h + bfeat_ref[...]


def _bn_relu_fc_kernel(h_ref, gamma_ref, beta_ref, wfc_ref, out_ref):
    """BatchNorm1d (full-batch stats) + ReLU + fc(bias=False), gridded over N.

    h_ref:     [B, F_pad]     pre-BN activations (f32; same block every step)
    gamma_ref: [1, F_pad]     BN weight (zero-padded)
    beta_ref:  [1, F_pad]     BN bias (zero-padded)
    wfc_ref:   [tn, F_pad]    final fc weight block
    out_ref:   [B, tn]        logits block (padding sliced off in the wrapper)
    """
    h = h_ref[...]                                        # [B, F_pad]
    # Batch statistics over the FULL batch (training-mode BN, biased variance);
    # cheap enough to recompute per N-block.  Affine folded into scale/shift.
    mean = jnp.mean(h, axis=0, keepdims=True)             # [1, F_pad]
    diff = h - mean
    var = jnp.mean(diff * diff, axis=0, keepdims=True)    # [1, F_pad]
    scale = gamma_ref[...] * jax.lax.rsqrt(var + BN_EPS)
    shift = beta_ref[...] - mean * scale
    a = jnp.maximum(h * scale + shift, 0.0)
    out_ref[...] = jax.lax.dot_general(
        a.astype(wfc_ref.dtype), wfc_ref[...],
        dimension_numbers=(((1,), (1,)), ((), ())),
        preferred_element_type=jnp.float32)


def lwf_forward(x_nchw, wfeat, bfeat, gamma, beta, wfc, *, max_hw_tile_lanes=None):
    """LWF head forward.

    x_nchw: [B, C, H, W]; wfeat: [F, C]; bfeat/gamma/beta: [F]; wfc: [N, F].
    Returns logits [B, N] in float32.
    """
    B, C, H, W = x_nchw.shape
    F = wfeat.shape[0]
    N = wfc.shape[0]
    HW = H * W

    budget = _vmem_budget()
    max_lanes = max_hw_tile_lanes if max_hw_tile_lanes is not None else budget["max_lanes"]

    # Zero-pad the spatial axis to a multiple of 128 so HW tiles are always
    # lane-aligned and double-buffered (no full-extent fallback block).
    HW_pad = _round_up(HW, LANE)
    x3 = x_nchw.reshape(B, C, HW)
    if HW_pad != HW:
        x3 = jnp.pad(x3, ((0, 0), (0, 0), (0, HW_pad - HW)))

    # Lane-pad F and N to multiples of 128 so h and out are lane-dense
    # (unmasked vst) and MXU columns are full.  Padding rows/cols are zero, so
    # padded BN columns normalize to 0 and padded fc rows/cols contribute 0.
    F_pad = _round_up(F, LANE)
    N_pad = _round_up(N, LANE)

    f32 = jnp.float32
    wfeat_p = jnp.zeros((F_pad, C), wfeat.dtype).at[:F, :].set(wfeat)
    bfeat_p = jnp.zeros((1, F_pad), f32).at[0, :F].set(bfeat.astype(f32))
    gamma_p = jnp.zeros((1, F_pad), f32).at[0, :F].set(gamma.astype(f32))
    beta_p = jnp.zeros((1, F_pad), f32).at[0, :F].set(beta.astype(f32))
    wfc_p = jnp.zeros((N_pad, F_pad), wfc.dtype).at[:N, :F].set(wfc)

    tb = _pick_batch_tile(B, C)
    thw = _pick_hw_tile(HW_pad, tb, C, x3.dtype.itemsize,
                        budget["tile_cap"], max_lanes)
    grid = (B // tb, HW_pad // thw)

    # ---- Kernel 1: streamed GAP + Linear(C -> F_pad) -> h [B, F_pad] ----
    gap_cost = pl.CostEstimate(
        flops=int(B * C * HW_pad + 2 * B * C * F_pad + B * F_pad),
        transcendentals=0,
        bytes_accessed=int(x3.size * x3.dtype.itemsize
                           + wfeat_p.size * wfeat_p.dtype.itemsize
                           + bfeat_p.size * 4 + B * F_pad * 4),
    )
    h = pl.pallas_call(
        functools.partial(_gap_linear_kernel,
                          inv_hw=float(1.0 / HW), nchunks=thw // LANE),
        out_shape=jax.ShapeDtypeStruct((B, F_pad), jnp.float32),
        grid_spec=pltpu.PrefetchScalarGridSpec(
            num_scalar_prefetch=0,
            grid=grid,
            in_specs=[
                pl.BlockSpec((tb, C, thw), lambda bi, hi: (bi, 0, hi)),
                pl.BlockSpec((F_pad, C), lambda bi, hi: (0, 0)),
                pl.BlockSpec((1, F_pad), lambda bi, hi: (0, 0)),
            ],
            out_specs=pl.BlockSpec((tb, F_pad), lambda bi, hi: (bi, 0)),
            scratch_shapes=[pltpu.VMEM((tb, C, LANE), jnp.float32)],
        ),
        compiler_params=pltpu.CompilerParams(
            dimension_semantics=("parallel", "arbitrary"),
            vmem_limit_bytes=budget["vmem_limit"],
        ),
        cost_estimate=gap_cost,
    )(x3, wfeat_p, bfeat_p)

    # ---- Kernel 2: BN (full-batch stats) + ReLU + fc -> logits [B, N_pad] ----
    # Gridded over N_pad ("parallel"): wfc streams in (tn, F_pad) blocks with
    # DMA/compute overlap; h (needed whole for full-batch BN stats) reuses the
    # same block every step so it is DMA'd only once.
    tn = _pick_n_tile(N_pad, F_pad, wfc_p.dtype.itemsize)
    fc_cost = pl.CostEstimate(
        flops=int(2 * B * F_pad * N_pad + 8 * B * F_pad * (N_pad // tn)),
        transcendentals=int(F_pad * (N_pad // tn)),
        bytes_accessed=int((B * F_pad + 3 * F_pad
                            + N_pad * F_pad + B * N_pad) * 4),
    )
    out_p = pl.pallas_call(
        _bn_relu_fc_kernel,
        out_shape=jax.ShapeDtypeStruct((B, N_pad), jnp.float32),
        grid_spec=pltpu.PrefetchScalarGridSpec(
            num_scalar_prefetch=0,
            grid=(N_pad // tn,),
            in_specs=[
                pl.BlockSpec((B, F_pad), lambda n: (0, 0)),
                pl.BlockSpec((1, F_pad), lambda n: (0, 0)),
                pl.BlockSpec((1, F_pad), lambda n: (0, 0)),
                pl.BlockSpec((tn, F_pad), lambda n: (n, 0)),
            ],
            out_specs=pl.BlockSpec((B, tn), lambda n: (0, n)),
        ),
        compiler_params=pltpu.CompilerParams(
            dimension_semantics=("parallel",),
            vmem_limit_bytes=budget["vmem_limit"],
        ),
        cost_estimate=fc_cost,
    )(h, gamma_p, beta_p, wfc_p)

    return out_p[:, :N]


def lwf_forward_ref(x_nchw, wfeat, bfeat, gamma, beta, wfc):
    """Plain-JAX reference for correctness checking."""
    B, C, H, W = x_nchw.shape
    feat = jnp.mean(x_nchw.reshape(B, C, H * W).astype(jnp.float32), axis=-1)
    h = feat @ wfeat.astype(jnp.float32).T + bfeat.astype(jnp.float32)
    mean = jnp.mean(h, axis=0, keepdims=True)
    var = jnp.mean((h - mean) ** 2, axis=0, keepdims=True)
    h = (h - mean) / jnp.sqrt(var + BN_EPS)
    h = h * gamma + beta
    h = jnp.maximum(h, 0.0)
    return h @ wfc.astype(jnp.float32).T


if __name__ == "__main__":
    # Small deterministic shapes; chosen so kernel 1 runs a real
    # (parallel B-blocks x arbitrary HW-blocks) = (2, 2) grid.
    B, C, H, W = 16, 8, 16, 16      # NCHW input; HW = 256
    feature_size = 32               # LWF feature_size  (padded to 128 internally)
    n_classes = 10                  # LWF n_classes     (padded to 128 internally)

    key = jax.random.PRNGKey(0)
    kx, kwf, kbf, kwc = jax.random.split(key, 4)

    x = jax.random.normal(kx, (B, C, H, W), dtype=jnp.float32)

    # feature_extractor.fc : Linear(C -> feature_size)
    wfeat = jax.random.normal(kwf, (feature_size, C), dtype=jnp.float32) * 0.1
    bfeat = jax.random.normal(kbf, (feature_size,), dtype=jnp.float32) * 0.1
    # BatchNorm1d(feature_size): PyTorch default init
    gamma = jnp.ones((feature_size,), dtype=jnp.float32)
    beta = jnp.zeros((feature_size,), dtype=jnp.float32)
    # fc : Linear(feature_size -> n_classes, bias=False)
    wfc = jax.random.normal(kwc, (n_classes, feature_size), dtype=jnp.float32) * 0.1

    # max_hw_tile_lanes=128 forces 2 HW grid steps at this toy size so the
    # pipelined accumulate / pl.when finalize path is actually exercised.
    out = lwf_forward(x, wfeat, bfeat, gamma, beta, wfc, max_hw_tile_lanes=128)
    out = jax.block_until_ready(out)

    ref = lwf_forward_ref(x, wfeat, bfeat, gamma, beta, wfc)
    assert out.shape == (B, n_classes)
    assert jnp.allclose(out, ref, atol=1e-4, rtol=1e-4), "mismatch vs reference"

    print("KERNEL_OK")
</pallas_src>

<mosaic_0001>
module attributes {stable_mosaic.version = 11 : i64} {
  func.func @_gap_linear_kernel(%arg0: i32, %arg1: i32, %arg2: memref<8x8x128xf32, #tpu.memory_space<vmem>>, %arg3: memref<128x8xf32, #tpu.memory_space<vmem>>, %arg4: memref<1x128xf32, #tpu.memory_space<vmem>>, %arg5: memref<8x128xf32, #tpu.memory_space<vmem>>, %arg6: memref<8x8x128xf32, #tpu.memory_space<vmem>>) attributes {dimension_semantics = [#tpu.dimension_semantics<parallel>, #tpu.dimension_semantics<arbitrary>], iteration_bounds = array<i64: 2, 2>, scalar_prefetch = 0 : i64, scratch_operands = 1 : i64, tpu.core_type = #tpu.core_type<tc>, window_params = [{transform_indices = @transform_0, window_bounds = array<i64: 8, 8, 128>}, {pipeline_mode = #tpu.pipeline_mode<synchronous>, transform_indices = @transform_1, window_bounds = array<i64: 128, 8>}, {pipeline_mode = #tpu.pipeline_mode<synchronous>, transform_indices = @transform_2, window_bounds = array<i64: 1, 128>}, {transform_indices = @transform_3, window_bounds = array<i64: 8, 128>}]} {
    %c0_i32 = arith.constant 0 : i32
    %0 = arith.cmpi eq, %arg1, %c0_i32 : i32
    %1 = arith.extui %0 : i1 to i32
    %c0_i32_0 = arith.constant 0 : i32
    %2 = arith.cmpi ne, %1, %c0_i32_0 : i32
    scf.if %2 {
      %cst = arith.constant 0.000000e+00 : f32
      %10 = vector.broadcast %cst : f32 to vector<8x8x128xf32>
      %c0_10 = arith.constant 0 : index
      %c0_11 = arith.constant 0 : index
      %c0_12 = arith.constant 0 : index
      %11 = vector.load %arg6[%c0_10, %c0_11, %c0_12] : memref<8x8x128xf32, #tpu.memory_space<vmem>>, vector<8x8x128xf32>
      tpu.vector_store %arg6[%c0_10, %c0_11, %c0_12], %10 {strides = array<i32>} : memref<8x8x128xf32, #tpu.memory_space<vmem>>, vector<8x8x128xf32>,
    } else {
    }
    %c0 = arith.constant 0 : index
    %c0_1 = arith.constant 0 : index
    %c0_2 = arith.constant 0 : index
    %3 = vector.load %arg6[%c0, %c0_1, %c0_2] : memref<8x8x128xf32, #tpu.memory_space<vmem>>, vector<8x8x128xf32>
    %c0_3 = arith.constant 0 : index
    %c0_4 = arith.constant 0 : index
    %c0_5 = arith.constant 0 : index
    %4 = vector.load %arg2[%c0_3, %c0_4, %c0_5] : memref<8x8x128xf32, #tpu.memory_space<vmem>>, vector<8x8x128xf32>
    %5 = arith.addf %3, %4 : vector<8x8x128xf32>
    %c0_6 = arith.constant 0 : index
    %c0_7 = arith.constant 0 : index
    %c0_8 = arith.constant 0 : index
    %6 = vector.load %arg6[%c0_6, %c0_7, %c0_8] : memref<8x8x128xf32, #tpu.memory_space<vmem>>, vector<8x8x128xf32>
    tpu.vector_store %arg6[%c0_6, %c0_7, %c0_8], %5 {strides = array<i32>} : memref<8x8x128xf32, #tpu.memory_space<vmem>>, vector<8x8x128xf32>,
    %c1_i32 = arith.constant 1 : i32
    %7 = arith.cmpi eq, %arg1, %c1_i32 : i32
    %8 = arith.extui %7 : i1 to i32
    %c0_i32_9 = arith.constant 0 : i32
    %9 = arith.cmpi ne, %8, %c0_i32_9 : i32
    scf.if %9 {
      %c0_10 = arith.constant 0 : index
      %c0_11 = arith.constant 0 : index
      %c0_12 = arith.constant 0 : index
      %10 = vector.load %arg6[%c0_10, %c0_11, %c0_12] : memref<8x8x128xf32, #tpu.memory_space<vmem>>, vector<8x8x128xf32>
      %cst = arith.constant dense<0.000000e+00> : vector<8x8xf32>
      %11 = vector.multi_reduction <add>, %10, %cst [2] : vector<8x8x128xf32> to vector<8x8xf32>
      %cst_13 = arith.constant 3.906250e-03 : f32
      %12 = vector.broadcast %cst_13 : f32 to vector<8x8xf32>
      %13 = arith.mulf %11, %12 : vector<8x8xf32>
      %c0_14 = arith.constant 0 : index
      %c0_15 = arith.constant 0 : index
      %14 = vector.load %arg3[%c0_14, %c0_15] : memref<128x8xf32, #tpu.memory_space<vmem>>, vector<128x8xf32>
      %cst_16 = arith.constant dense<0.000000e+00> : vector<8x128xf32>
      %15 = tpu.matmul %13, %14, %cst_16 {dimension_numbers = #tpu.dot_dimension_numbers<[1], [1], [0], [0], [0, 0, 1, 0], [], []>} : vector<8x8xf32>, vector<128x8xf32>, vector<8x128xf32> -> vector<8x128xf32>
      %c0_17 = arith.constant 0 : index
      %c0_18 = arith.constant 0 : index
      %16 = vector.load %arg4[%c0_17, %c0_18] : memref<1x128xf32, #tpu.memory_space<vmem>>, vector<1x128xf32>
      %17 = vector.broadcast %16 : vector<1x128xf32> to vector<8x128xf32>
      %18 = arith.addf %15, %17 : vector<8x128xf32>
      %c0_19 = arith.constant 0 : index
      %c0_20 = arith.constant 0 : index
      %19 = vector.load %arg5[%c0_19, %c0_20] : memref<8x128xf32, #tpu.memory_space<vmem>>, vector<8x128xf32>
      tpu.vector_store %arg5[%c0_19, %c0_20], %18 {strides = array<i32>} : memref<8x128xf32, #tpu.memory_space<vmem>>, vector<8x128xf32>,
    } else {
    }
    return
  }
  func.func @transform_0(%arg0: i32, %arg1: i32) -> (i32, i32, i32) {
    %c0_i32 = arith.constant 0 : i32
    %c0_i32_0 = arith.constant 0 : i32
    return %arg0, %c0_i32, %arg1 : i32, i32, i32
  }
  func.func @transform_1(%arg0: i32, %arg1: i32) -> (i32, i32) {
    %c0_i32 = arith.constant 0 : i32
    %c0_i32_0 = arith.constant 0 : i32
    %c0_i32_1 = arith.constant 0 : i32
    return %c0_i32, %c0_i32_0 : i32, i32
  }
  func.func @transform_2(%arg0: i32, %arg1: i32) -> (i32, i32) {
    %c0_i32 = arith.constant 0 : i32
    %c0_i32_0 = arith.constant 0 : i32
    %c0_i32_1 = arith.constant 0 : i32
    return %c0_i32, %c0_i32_0 : i32, i32
  }
  func.func @transform_3(%arg0: i32, %arg1: i32) -> (i32, i32) {
    %c0_i32 = arith.constant 0 : i32
    %c0_i32_0 = arith.constant 0 : i32
    return %arg0, %c0_i32 : i32, i32
  }
}

</mosaic_0001>

<bundles_post_ra>
// kernel: tpu_custom_call.1
= control target key start
LH: loop header
LB: loop body
LE: loop exit
PB: predicated region body
PF: predicated region fallthrough
CT: control target
= control target key end

     0   :  { %8 = vsyncpa [#allocation4], 0  ;;  %s1088_s0 = inlined_call_operand.hbm [shape: f32[16,8,256], index: 0, kind: input, shape index: {}]   ;;  %s1089_s1 = inlined_call_operand.vmem [shape: f32[128,8], index: 1, kind: input, shape index: {}]   ;;  %s1090_s2 = inlined_call_operand.vmem [shape: f32[1,128], index: 2, kind: input, shape index: {}]   ;;  %s1091_s3 = inlined_call_operand.hbm [shape: f32[16,128], index: 3, kind: output, shape index: {}]  }
   0x1   :  { %10 = vsyncpa [#allocation4 + $0x1], 0 }
   0x2   :  { %11 = vsyncpa [#allocation5], 0 }
   0x3   :  { %13 = vsyncpa [#allocation5 + $0x1], 0  ;;  %s831_s12 = smov 0   ;;  %s833_s13 = smov 0  }
   0x4   :  { %s835_s14 = smov 0   ;;  %s837_s15 = smov 0  }
   0x5   :  { %s839_s16 = smov 0   ;;  %s841_s17 = smov 0  }
   0x6   :  { %s843_s18 = smov 0   ;;  %s845_s19 = smov 0  }
   0x7   :  { %s847_s20 = smov 0   ;;  %s849_s21 = smov 0  }
   0x8   :  { %s851_s22 = smov 0  }
   0x9 LB: > { %1096 = sst [smem:[#allocation9_spill]] %s773_s14  ;;  %s511_s23 = sadd.s32 4294967295, %s805_s22   ;;  %s805_s22 = sphi %s851_s22, %s19_s22   ;;  %s801_s21 = sphi %s849_s21, %s1120_s21   ;;  %s797_s20 = sphi %s847_s20, %s1119_s20   ;;  %s793_s19 = sphi %s845_s19, %s1118_s19   ;;  %s789_s18 = sphi %s843_s18, %s1117_s18   ;;  %s785_s17 = sphi %s841_s17, %s1116_s17   ;;  %s781_s16 = sphi %s839_s16, %s1115_s16   ;;  %s777_s15 = sphi %s837_s15, %s1114_s15   ;;  %s773_s14 = sphi %s835_s14, %s1107_s14   ;;  %s769_s13 = sphi %s833_s13, %s1113_s13   ;;  %s765_s12 = sphi %s831_s12, %s1112_s12  }
   0xa   : > { %1097 = sst [smem:[#allocation10_spill]] %s785_s17  ;;  %s512_s24 = sadd.s32 4294967294, %s805_s22  }
   0xb   : > { %s28_s25 = sadd.s32 1, %s797_s20  ;;  %s31_s26 = sadd.s32 1, %s801_s21 }
   0xc   : > { %p29_p0 = scmp.ge.s32.totalorder %s28_s25, 2  ;;  %s40_s27 = sadd.s32 1, %s785_s17 }
   0xd   : > { %p47_p1 = scmp.ne.s32.totalorder %s785_s17, %s781_s16  ;;  %p48_p2 = scmp.eq.s32.totalorder %s805_s22, 0 }
   0xe   : > { %s1122_s25 = smov (%p29_p0, %s28_s25), 0  ;;  %s1124_s26 = smov (!%p29_p0, %s31_s26), %s801_s21 }
   0xf   : > { %1098 = sst [smem:[#allocation11_spill]] %s1122_s25  ;;  %s36_s28 = ssub.s32 %s797_s20, %s1122_s25 }
  0x10   : > { %p897_p3 = por %p48_p2, %p47_p1  ;;  %p33_p4 = scmp.ge.s32.totalorder %s1124_s26, 2 }
  0x11   : > { %p53_p5 = scmp.ne.s32.totalorder %s781_s16, %s777_s15  ;;  %p54_p6 = scmp.eq.s32.totalorder %s511_s23, 0 }
  0x12   : > { %s108_s30 = sadd.s32 1, %s773_s14  ;;  %s1126_s26 = smov (%p33_p4, %s1124_s26), 0 }
  0x13   : > { %1100 = sst [smem:[#allocation12_spill]] %s1126_s26  ;;  %p905_p7 = por %p54_p6, %p53_p5 }
  0x14   : > { %p118_p8 = scmp.ne.s32.totalorder %s773_s14, %s769_s13  ;;  %s35_s5 = ssub.s32 %s801_s21, %s1126_s26 }
  0x15   : > { %p119_p9 = scmp.eq.s32.totalorder %s511_s23, 3  ;;  %s37_s6 = sor.u32 %s36_s28, %s35_s5 }
  0x16   : > { %p106_p10 = scmp.eq.s32.totalorder %s35_s5, 0  ;;  %p38_p11 = scmp.eq.s32.totalorder %s37_s6, 0 }
  0x17   : > { %p913_p12 = por %p119_p9, %p118_p8  ;;  %p124_p13 = scmp.ne.s32.totalorder %s769_s13, %s765_s12 }
  0x18   : > { %s918_s8 = scalar_select %p106_p10, %s773_s14, %s108_s30  }
  0x19   : > { %s921_s9 = scalar_select %p38_p11, %s785_s17, %s40_s27  }
  0x1a   : > { %1103 = sst [smem:[#allocation13_spill]] %s918_s8  ;;  %p125_p0 = scmp.eq.s32.totalorder %s512_s24, 3 }
  0x1b   : > { %1104 = sst [smem:[#allocation14_spill]] %s921_s9  ;;  %p558_p1 = scmp.lt.s32.totalorder %s805_s22, 4 }
  0x1c   : > { %p926_p2 = por %p125_p0, %p124_p13  ;;  %s151_s11 = sand.u32 1, %s785_s17  }
  0x1d   : > { %s515_s15 = sshll.u32 %s151_s11, 6  ;;  %s545_s23 = sshll.u32 %s801_s21, 4 }
  0x1e   : > { %s160_s28 = sadd.s32 %s797_s20, %s545_s23  ;;  %s155_s5 = scalar_lea.vmem [#allocation3], %s515_s15 }
  0x1f   : > { %s165_s6 = sshll.u32 %s155_s5, 4  ;;  %s518_s26 = sshll.u32 %s160_s28, 3  ;;  %s166_s6 = int_to_ptr.vmem [resolvable:$true] %s165_s6 }
  0x20   : > { %s162_s25 = scalar_lea.hbm %s1088_s0, %s518_s26  ;;  %p551_p4 = pnand %p558_p1, %p897_p3 }
  0x21   : > { %s163_s24 = sshll.u32 %s162_s25, 4  ;;  %s152_s9 = scalar_lea.sflag [#allocation4], %s151_s11  ;;  %s164_s24 = int_to_ptr.hbm [resolvable:$true] %s163_s24 }
  0x22   : > { %s807_s8 = smov 256   ;;  %s808_s17 = smov 128  }
  0x23   : > { %s809_s14 = smov 8   ;;  %p519_p5 = scmp.ge.s32.totalorder %s805_s22, 1 }
  0x24   : > { %553 = dma.hbm_to_vmem [thread:$0]  (!%p551_p4), %s164_s24, 1024, %s166_s6, %s152_s9, %s807_s8, %s808_s17, %s809_s14  }
  0x25   : > { %p173_p6 = scmp.lt.s32.totalorder %s805_s22, 5 }
  0x27   : > { %p174_p8 = pnand %p519_p5, %p173_p6 }
  0x28   : > { %s179_s15 = sand.u32 (!%p174_p8), 1, %s781_s16  }
  0x29   : > { %177 = sbr.rel (%p174_p8) target bundleno = 357 (0x165), region = 32  ;;  %s520_s23 = sshll.u32 (!%p174_p8), %s179_s15, 6 }
  0x2a   : > { %s180_s28 = scalar_lea.sflag (!%p174_p8), [#allocation4], %s179_s15  ;;  %s941_s5 = scalar_lea.vmem (!%p174_p8), [#allocation3], %s520_s23 }
  0x2e   : > { %756 = dma.done.wait (%p905_p7), %s180_s28, 1024  }
  0x2f   : > { %758 = vsyncadd (%p905_p7), %s180_s28, 4294966272  ;;  %s204_s25 = sand.u32 1, %s769_s13   ;;  %p522_p3 = scmp.ne.s32.totalorder %s789_s18, 0 }
  0x30   : > { %s950_s14 = sshll.u32 %s204_s25, 3 }
  0x31   : > { %s206_s17 = scalar_lea.vmem [#allocation6], %s950_s14  ;;  %211 = sbr.rel (%p522_p3) target bundleno = 63 (0x3f), region = 40 }
  0x36   : > { %v810_v0 = vmov 0.0  }
  0x37   : > { %212 = vst [vmem:[#allocation2 + $0x30] sm:$0xff] %v810_v0 }
  0x38   : > { %213 = vst [vmem:[#allocation2] sm:$0xff] %v810_v0 }
  0x39   : > { %214 = vst [vmem:[#allocation2 + $0x18] sm:$0xff] %v810_v0 }
  0x3a   : > { %215 = vst [vmem:[#allocation2 + $0x10] sm:$0xff] %v810_v0 }
  0x3b   : > { %216 = vst [vmem:[#allocation2 + $0x8] sm:$0xff] %v810_v0 }
  0x3c   : > { %217 = vst [vmem:[#allocation2 + $0x20] sm:$0xff] %v810_v0 }
  0x3d   : > { %218 = vst [vmem:[#allocation2 + $0x28] sm:$0xff] %v810_v0 }
  0x3e   : > { %219 = vst [vmem:[#allocation2 + $0x38] sm:$0xff] %v810_v0 }
  0x3f PF: > { %v220_v1 = vld [vmem:[#allocation2 + $0x30] sm:$0xff]  ;;  %v228_v2 = vld [vmem:[%s941_s5] sm:$0xff]  ;;  %v229_v5 = vld [vmem:[%s941_s5 + $0x8] sm:$0xff]  ;;  %p523_p7 = scmp.ne.s32.totalorder %s789_s18, 1 }
  0x40   : > { %v221_v3 = vld [vmem:[#allocation2] sm:$0xff]  ;;  %v236_v4 = vadd.f32 %v228_v2, %v220_v1  ;;  %v222_v6 = vld [vmem:[#allocation2 + $0x18] sm:$0xff]  ;;  %v230_v7 = vld [vmem:[%s941_s5 + $0x10] sm:$0xff] }
  0x41   : > { %v237_v8 = vadd.f32 %v229_v5, %v221_v3  ;;  %v238_v9 = vadd.f32 %v230_v7, %v222_v6  ;;  %v223_v10 = vld [vmem:[#allocation2 + $0x10] sm:$0xff]  ;;  %v231_v11 = vld [vmem:[%s941_s5 + $0x18] sm:$0xff]  ;;  %v232_v14 = vld [vmem:[%s941_s5 + $0x20] sm:$0xff] }
  0x42   : > { %v224_v12 = vld [vmem:[#allocation2 + $0x8] sm:$0xff]  ;;  %244 = vst [vmem:[#allocation2 + $0x30] sm:$0xff] %v236_v4  ;;  %v239_v13 = vadd.f32 %v231_v11, %v223_v10  ;;  %v234_v20 = vld [vmem:[%s941_s5 + $0x30] sm:$0xff]  ;;  %v235_v23 = vld [vmem:[%s941_s5 + $0x38] sm:$0xff] }
  0x43   : > { %v225_v15 = vld [vmem:[#allocation2 + $0x20] sm:$0xff]  ;;  %v233_v16 = vld [vmem:[%s941_s5 + $0x28] sm:$0xff]  ;;  %245 = vst [vmem:[#allocation2] sm:$0xff] %v237_v8  ;;  %v240_v17 = vadd.f32 %v232_v14, %v224_v12 }
  0x44   : > { %v241_v18 = vadd.f32 %v233_v16, %v225_v15  ;;  %v226_v19 = vld [vmem:[#allocation2 + $0x28] sm:$0xff]  ;;  %246 = vst [vmem:[#allocation2 + $0x18] sm:$0xff] %v238_v9 }
  0x45   : > { %v227_v21 = vld [vmem:[#allocation2 + $0x38] sm:$0xff]  ;;  %v242_v22 = vadd.f32 %v234_v20, %v226_v19  ;;  %247 = vst [vmem:[#allocation2 + $0x10] sm:$0xff] %v239_v13  ;;  %255 = sbr.rel (%p523_p7) target bundleno = 342 (0x156), region = 44 }
  0x46   : > { %v243_v24 = vadd.f32 %v235_v23, %v227_v21  ;;  %248 = vst [vmem:[#allocation2 + $0x8] sm:$0xff] %v240_v17 }
  0x47   : > { %249 = vst [vmem:[#allocation2 + $0x20] sm:$0xff] %v241_v18 }
  0x48   : > { %250 = vst [vmem:[#allocation2 + $0x28] sm:$0xff] %v242_v22 }
  0x49   : > { %251 = vst [vmem:[#allocation2 + $0x38] sm:$0xff] %v243_v24 }
  0x4a   : > { %v256_v25 = vld [vmem:[#allocation2 + $0x30] sm:$0xff]  ;;  %vm340_vm0 = vcmask 64512   ;;  %v303_v28 = vld [vmem:[%s1089_s1 + $0x78] sm:$0xff]  ;;  %v257_v30 = vld [vmem:[#allocation2] sm:$0xff]  ;;  %v316_v52 = vlaneseq  ;;  %vm326_vm1 = vcmask 1041409   ;;  %vm328_vm2 = vcmask 1042434  }
  0x4b   : > { %v258_v26 = vld [vmem:[#allocation2 + $0x18] sm:$0xff]  ;;  %264 = vadd.xlane.f32.xlu0 %v256_v25  ;;  %524 = vmatpush.xpose.msk.msra.mxu0 %vm340_vm0, %v303_v28  ;;  %v302_v29 = vld [vmem:[%s1089_s1 + $0x70] sm:$0xff]  ;;  %v301_v33 = vld [vmem:[%s1089_s1 + $0x68] sm:$0xff]  ;;  %vm330_vm3 = vcmask 1043459   ;;  %vm332_vm4 = vcmask 1044484   ;;  %vm334_vm5 = vcmask 1045509  }
  0x4c   : > { %268 = vadd.xlane.f32.xlu1 %v258_v26  ;;  %v259_v31 = vld [vmem:[#allocation2 + $0x10] sm:$0xff]  ;;  %v300_v34 = vld [vmem:[%s1089_s1 + $0x60] sm:$0xff]  ;;  %v299_v37 = vld [vmem:[%s1089_s1 + $0x58] sm:$0xff]  ;;  %v317_v53 = vand.u32 127, %v316_v52  ;;  %vm336_vm6 = vcmask 1046534   ;;  %vm338_vm7 = vcmask 1047559  }
  0x4d   : > { %v260_v27 = vld [vmem:[#allocation2 + $0x8] sm:$0xff]  ;;  %v298_v38 = vld [vmem:[%s1089_s1 + $0x50] sm:$0xff]  ;;  %v296_v40 = vld [vmem:[%s1089_s1 + $0x40] sm:$0xff] }
  0x4e   : > { %272 = vadd.xlane.f32.xlu2 %v260_v27  ;;  %v261_v32 = vld [vmem:[#allocation2 + $0x20] sm:$0xff]  ;;  %v297_v39 = vld [vmem:[%s1089_s1 + $0x48] sm:$0xff]  ;;  %v295_v41 = vld [vmem:[%s1089_s1 + $0x38] sm:$0xff] }
  0x4f   : > { %525 = vmatpush.xpose.msk.msra.mxu0 %vm340_vm0, %v302_v29  ;;  %v262_v35 = vld [vmem:[#allocation2 + $0x28] sm:$0xff]  ;;  %v294_v42 = vld [vmem:[%s1089_s1 + $0x30] sm:$0xff]  ;;  %v292_v44 = vld [vmem:[%s1089_s1 + $0x20] sm:$0xff] }
  0x50   : > { %v263_v36 = vld [vmem:[#allocation2 + $0x38] sm:$0xff]  ;;  %v293_v43 = vld [vmem:[%s1089_s1 + $0x28] sm:$0xff]  ;;  %v290_v46 = vld [vmem:[%s1089_s1 + $0x10] sm:$0xff] }
  0x51   : > { %v291_v45 = vld [vmem:[%s1089_s1 + $0x18] sm:$0xff]  ;;  %v289_v47 = vld [vmem:[%s1089_s1 + $0x8] sm:$0xff]  ;;  %v288_v48 = vld [vmem:[%s1089_s1] sm:$0xff] }
  0x52   : > { %v652_v18 = vld [vmem:[%s1090_s2] ss:$0 sm:$0xff] }
  0x53   : > { %266 = vadd.xlane.f32.xlu0 %v257_v30  ;;  %526 = vmatpush.xpose.msk.msra.mxu0 %vm340_vm0, %v301_v33 }
  0x54   : > { %270 = vadd.xlane.f32.xlu1 %v259_v31 }
  0x56   : > { %274 = vadd.xlane.f32.xlu2 %v261_v32 }
  0x57   : > { %527 = vmatpush.xpose.msk.msra.mxu0 %vm340_vm0, %v300_v34 }
  0x5b   : > { %276 = vadd.xlane.f32.xlu0 %v262_v35  ;;  %528 = vmatpush.xpose.msk.msra.mxu0 %vm340_vm0, %v299_v37 }
  0x5c   : > { %278 = vadd.xlane.f32.xlu1 %v263_v36 }
  0x5f   : > { %529 = vmatpush.xpose.msk.msra.mxu0 %vm340_vm0, %v298_v38 }
  0x63   : > { %530 = vmatpush.xpose.msk.msra.mxu0 %vm340_vm0, %v297_v39 }
  0x67   : > { %531 = vmatpush.xpose.msk.msra.mxu0 %vm340_vm0, %v296_v40 }
  0x6b   : > { %532 = vmatpush.xpose.msk.msra.mxu0 %vm340_vm0, %v295_v41 }
  0x6f   : > { %533 = vmatpush.xpose.msk.msra.mxu0 %vm340_vm0, %v294_v42 }
  0x73   : > { %534 = vmatpush.xpose.msk.msra.mxu0 %vm340_vm0, %v293_v43 }
  0x77   : > { %535 = vmatpush.xpose.msk.msra.mxu0 %vm340_vm0, %v292_v44 }
  0x7b   : > { %536 = vmatpush.xpose.msk.msra.mxu0 %vm340_vm0, %v291_v45 }
  0x7f   : > { %537 = vmatpush.xpose.msk.msra.mxu0 %vm340_vm0, %v290_v46 }
  0x83   : > { %538 = vmatpush.xpose.msk.msra.mxu0 %vm340_vm0, %v289_v47 }
  0x87   : > { %539 = vmatpush.xpose.msk.msra.mxu0 %vm340_vm0, %v288_v48 }
  0xbe   : > { %v265_v49 = vpop.xlane.xlu0 %264 }
  0xbf   : > { %v269_v50 = vpop.xlane.xlu1 %268  ;;  %v280_v54 = vmul.f32 0.00390625, %v265_v49 }
  0xc0   : > { %v282_v55 = vmul.f32 0.00390625, %v269_v50 }
  0xc1   : > { %v273_v51 = vpop.xlane.xlu2 %272  ;;  %v318_v61 = vperm.slane %v280_v54, %v317_v53 }
  0xc2   : > { %v284_v62 = vmul.f32 0.00390625, %v273_v51  ;;  %v320_v1 = vperm.slane %v282_v55, %v317_v53 }
  0xc4   : > { %v322_v5 = vperm.slane %v284_v62, %v317_v53 }
  0xc6   : > { %v267_v56 = vpop.xlane.xlu0 %266 }
  0xc7   : > { %v271_v57 = vpop.xlane.xlu1 %270  ;;  %v281_v58 = vmul.f32 0.00390625, %v267_v56 }
  0xc8   : > { %v283_v59 = vmul.f32 0.00390625, %v271_v57 }
  0xc9   : > { %v275_v60 = vpop.xlane.xlu2 %274  ;;  %v319_v63 = vperm.slane %v281_v58, %v317_v53 }
  0xca   : > { %v321_v0 = vperm.slane %v283_v59, %v317_v53  ;;  %v285_v2 = vmul.f32 0.00390625, %v275_v60 }
  0xcb   : > { %v327_v3 = vsel %vm326_vm1, %v319_v63, %v318_v61 }
  0xcc   : > { %v329_v4 = vsel %vm328_vm2, %v320_v1, %v327_v3  ;;  %v323_v7 = vperm.slane %v285_v2, %v317_v53 }
  0xcd   : > { %v331_v6 = vsel %vm330_vm3, %v321_v0, %v329_v4 }
  0xce   : > { %v277_v8 = vpop.xlane.xlu0 %276  ;;  %v333_v12 = vsel %vm332_vm4, %v322_v5, %v331_v6 }
  0xcf   : > { %v279_v9 = vpop.xlane.xlu1 %278  ;;  %v286_v10 = vmul.f32 0.00390625, %v277_v8  ;;  %v335_v15 = vsel %vm334_vm5, %v323_v7, %v333_v12 }
  0xd0   : > { %v287_v11 = vmul.f32 0.00390625, %v279_v9 }
  0xd1   : > { %v324_v13 = vperm.slane %v286_v10, %v317_v53 }
  0xd2   : > { %v325_v14 = vperm.slane %v287_v11, %v317_v53 }
  0xd3   : > { %v337_v16 = vsel %vm336_vm6, %v324_v13, %v335_v15 }
  0xd4   : > { %v339_v17 = vsel %vm338_vm7, %v325_v14, %v337_v16 }
  0xd5   : > { %540 = vmatmul.msk.f32.vlgmr.msra.gmra.mxu0 %vm340_vm0, %v339_v17 }
 0x152   : > { %v408_v19 = vpop.f32.mrf.mxu0 }
 0x153   : > { %v409_v20 = vadd.f32 %v652_v18, %v408_v19 }
 0x155   : > { %411 = vst [vmem:[%s206_s17] sm:$0xff] %v409_v20 }
 0x156 PF: > { %s542_s18 = sshll.u32 %s793_s19, 3  ;;  %s425_s30 = sshll.u32 %s206_s17, 4  ;;  %s426_s30 = int_to_ptr.vmem [resolvable:$true] %s425_s30 }
 0x157   : > { %s423_s6 = scalar_lea.hbm %s1091_s3, %s542_s18  ;;  %s413_s24 = scalar_lea.sflag [#allocation5], %s204_s25 }
 0x158   : > { %s427_s27 = sshll.u32 %s423_s6, 4  ;;  %s703_s5 = scalar_lea.hbm %s1091_s3, 16  ;;  %s428_s27 = int_to_ptr.hbm [resolvable:$true] %s427_s27 }
 0x159   : > { %s697_s15 = sshra.s32 %s428_s27, 4  ;;  %s698_s15 = int_to_ptr.hbm [resolvable:$true] %s697_s15 }
 0x15a   : > { %s699_s23 = scalar_lea.hbm %s698_s15, 8  ;;  %p704_p13 = scmp.lt.s32.totalorder %s698_s15, %s1091_s3 }
 0x15b   : > { %p700_p9 = scmp.ne.s32.totalorder %s698_s15, %s699_s23  ;;  %p705_p0 = scmp.lt.s32.totalorder %s703_s5, %s699_s23 }
 0x15d   : > { %p701_p10 = pnand %p700_p9, %p913_p12  ;;  %p706_p1 = por %p705_p0, %p704_p13 }
 0x15f   : > { %p702_p11 = pneg %p701_p10 }
 0x161   : > { %p707_p4 = pnand %p706_p1, %p702_p11 }
 0x163   : > { %710 = shalt.err (!%p707_p4)
}
 0x164   : > { %548 = dma.vmem_to_hbm [thread:$0]  (%p913_p12), %s426_s30, 128, %s428_s27, %s413_s24  }
 0x165 PF: > { %p559_p5 = scmp.ge.s32.totalorder %s805_s22, 2  ;;  %s439_s25 = sand.u32 1, %s765_s12  }
 0x166   : > { %s440_s14 = scalar_lea.sflag [#allocation5], %s439_s25 }
 0x167   : > { %p555_p6 = pnand %p559_p5, %p926_p2 }
 0x169   : > { %p556_p8 = pneg %p555_p6 }
 0x16b   : > { %760 = dma.done.wait (%p556_p8), %s440_s14, 128  }
 0x16c   : > { %762 = vsyncadd (%p556_p8), %s440_s14, 4294967168  ;;  %s19_s22 = sadd.s32 1, %s805_s22   ;;  %s1106_s17 = sld [smem:[#allocation9_spill]] }
 0x16d   : > { %p16_p3 = scmp.ge.s32.totalorder %s19_s22, 6   ;;  %s1107_s14 = sld [smem:[#allocation13_spill]] }
 0x16e   : > { %s1108_s7 = sld [smem:[#allocation10_spill]]  ;;  %s1112_s12 = smov %s769_s13 }
 0x16f   : > { %s1109_s4 = sld [smem:[#allocation14_spill]]  ;;  %s1114_s15 = smov %s781_s16 }
 0x170   : > { %s1110_s8 = sld [smem:[#allocation11_spill]]  ;;  %s1117_s18 = smov %s797_s20 }
 0x171   : > { %s1111_s9 = sld [smem:[#allocation12_spill]]  ;;  %s1118_s19 = smov %s801_s21 }
 0x172   : > { %s1113_s13 = smov %s1106_s17 }
 0x173   :  { %18 = sbr.rel (!%p16_p3) target bundleno = 9 (0x9), region = 85 }
 0x174   : > { %s1115_s16 = smov %s1108_s7 }
 0x175   : > { %s1116_s17 = smov %s1109_s4 }
 0x176   : > { %s1119_s20 = smov %s1110_s8 }
 0x177   : > { %s1120_s21 = smov %s1111_s9 }
 0x178   :  { %446 = vsyncpa [#allocation4], 1 }
 0x179   :  { %448 = vsyncpa [#allocation4 + $0x1], 1 }
 0x17a   :  { %449 = vsyncpa [#allocation5], 1 }
 0x17b   :  { %451 = vsyncpa [#allocation5 + $0x1], 1 }

</bundles_post_ra>
